<compile_context>
chip_gen: v7x
topology: tpu7x:2x2x1
jax: 0.10.0
libtpu: 0.0.40
codegen_flags: <defaults>
</compile_context>

<pallas_src>
import jax
import jax.numpy as jnp
from jax.experimental import pallas as pl
from jax.experimental.pallas import tpu as pltpu


def _round_up(x, m):
    return ((x + m - 1) // m) * m


def _cdiv(a, b):
    return (a + b - 1) // b


def _vmem_capacity_bytes():
    """Per-core physical VMEM; falls back to the smallest current gen (v7x)."""
    try:
        return int(pltpu.get_tpu_info().vmem_capacity_bytes)
    except Exception:
        return 64 << 20


def _ffn_pe_kernel(pos_ref, w1_ref, b1_ref, w2_ref, b2_ref, feat_ref, out_ref):
    # pos_ref:  (rt, P*d_in)        packed positions, P points per row
    # w1_ref:   (P*d_in,  P*d_hid)  block-diagonal, eval-mode BN folded in
    # b1_ref:   (1, P*d_hid)
    # w2_ref:   (P*d_hid, P*d_out)  block-diagonal
    # b2_ref:   (1, P*d_out)
    # feat_ref: (rt, P*d_out)       packed point features
    # out_ref:  (rt, P*d_out)
    x = pos_ref[...].astype(jnp.float32)
    # Conv1d #1 (1x1 conv == per-point matmul), BN already folded into w1/b1.
    h = jnp.dot(x, w1_ref[...], preferred_element_type=jnp.float32) + b1_ref[...]
    h = jnp.maximum(h, 0.0)
    # Conv1d #2 + bias.
    pe = jnp.dot(h, w2_ref[...], preferred_element_type=jnp.float32) + b2_ref[...]
    out_ref[...] = (feat_ref[...].astype(jnp.float32) + pe).astype(out_ref.dtype)


def feed_forward_positional_encoding(point_features, positional_input, params,
                                     *, tile_points=16384):
    """point_features: (B, N, d_out), positional_input: (B, N, d_in)."""
    B, N, d_out = point_features.shape
    d_in = positional_input.shape[-1]
    d_hid = params["w1"].shape[1]
    M = B * N

    # Pack P points per row so the feat/out streams are lane-dense.  P=256//d_out
    # also makes the second matmul's N dim 256 (matches the 256-wide MXU) and
    # halves the lane-padding waste of the narrow pos stream vs P=128//d_out.
    if d_out <= 256 and 256 % d_out == 0:
        P = 256 // d_out
    elif d_out < 128 and 128 % d_out == 0:
        P = 128 // d_out
    else:
        P = 1

    # Pad M only up to a multiple of P (never to a full tile); ragged tile
    # boundaries are handled with a ceil-division grid + partial final block.
    m_pad = _round_up(M, P)
    R = m_pad // P                                   # packed rows

    pos2d = positional_input.reshape(M, d_in)
    feat2d = point_features.reshape(M, d_out)
    if m_pad != M:
        # NOTE: this small pad still copies pos/feat once outside the kernel;
        # real callers should keep M % P == 0 (or carry the packed layout
        # across adjacent ops) to avoid it entirely.
        pad = m_pad - M
        pos2d = jnp.pad(pos2d, ((0, pad), (0, 0)))
        feat2d = jnp.pad(feat2d, ((0, pad), (0, 0)))
    pos_p = pos2d.reshape(R, P * d_in)
    feat_p = feat2d.reshape(R, P * d_out)

    # ---------------- tile sizing / VMEM budget ----------------
    # Streamed bytes per packed row in VMEM.  The narrow pos row (P*d_in lanes)
    # pads to 128 lanes, so it must be budgeted at the padded size.
    pos_row_b = _round_up(P * d_in, 128) * positional_input.dtype.itemsize
    feat_row_b = _round_up(P * d_out, 128) * point_features.dtype.itemsize
    stream_row_b = pos_row_b + 2 * feat_row_b        # pos + feat + out

    vmem_cap = _vmem_capacity_bytes()
    # Double-buffered streamed working-set target: <= ~40% of physical VMEM,
    # capped at 28 MiB (safe on v5e/v6e once the scoped limit is raised, and on
    # v7x's 64 MiB physical VMEM).
    stream_budget = min(28 << 20, (vmem_cap * 2) // 5)

    max_rows_pts = max(8, tile_points // P)
    max_rows_mem = max(8, stream_budget // (2 * stream_row_b))
    rt = min(R, max_rows_pts, max_rows_mem)
    if rt >= R:
        rt = R                                       # single full-extent block
    else:
        rt = max(8, (rt // 8) * 8)                   # sublane alignment
        # Keep >= 4 grid steps when the input is big enough so the "parallel"
        # axis shards across v7x's two TensorCores and the pipeline overlaps.
        rt = min(rt, max(8, _round_up(_cdiv(R, 4), 8)))
        if rt >= R:
            rt = R
    grid = (_cdiv(R, rt),)

    # VMEM-resident weight tiles (constant index maps) + headroom, then raise
    # the scoped-VMEM limit explicitly (v5e defaults to 16 MiB scoped).
    def _tile_bytes(r, c, itemsize=4):
        return _round_up(max(r, 1), 8) * _round_up(max(c, 1), 128) * itemsize
    weights_b = (_tile_bytes(P * d_in, P * d_hid) + _tile_bytes(1, P * d_hid)
                 + _tile_bytes(P * d_hid, P * d_out) + _tile_bytes(1, P * d_out))
    footprint = 2 * rt * stream_row_b + 2 * weights_b
    vmem_limit = int(min(max(24 << 20, footprint + (8 << 20)),
                         (vmem_cap * 9) // 10))

    # Fold eval-mode BatchNorm into conv1, then expand both 1x1 convs to
    # block-diagonal form so the P packed points are processed independently.
    w1_eff = params["w1"] * params["bn_scale"]                        # (d_in, d_hid)
    b1_eff = params["b1"] * params["bn_scale"] + params["bn_shift"]   # (1, d_hid)
    eye_p = jnp.eye(P, dtype=jnp.float32)
    w1_blk = jnp.kron(eye_p, w1_eff)            # (P*d_in,  P*d_hid)
    w2_blk = jnp.kron(eye_p, params["w2"])      # (P*d_hid, P*d_out)
    b1_blk = jnp.tile(b1_eff, (1, P))           # (1, P*d_hid)
    b2_blk = jnp.tile(params["b2"], (1, P))     # (1, P*d_out)

    const = lambda i: (0, 0)
    tiled = lambda i: (i, 0)

    out_p = pl.pallas_call(
        _ffn_pe_kernel,
        out_shape=jax.ShapeDtypeStruct((R, P * d_out), point_features.dtype),
        grid=grid,
        in_specs=[
            pl.BlockSpec((rt, P * d_in), tiled),           # pos   (streamed)
            pl.BlockSpec((P * d_in, P * d_hid), const),    # w1    (VMEM-resident)
            pl.BlockSpec((1, P * d_hid), const),           # b1
            pl.BlockSpec((P * d_hid, P * d_out), const),   # w2
            pl.BlockSpec((1, P * d_out), const),           # b2
            pl.BlockSpec((rt, P * d_out), tiled),          # feat  (streamed)
        ],
        out_specs=pl.BlockSpec((rt, P * d_out), tiled),
        input_output_aliases={5: 0},     # reuse the packed feat buffer for out
        compiler_params=pltpu.CompilerParams(
            dimension_semantics=("parallel",),             # megacore sharding
            vmem_limit_bytes=vmem_limit),
    )(pos_p, w1_blk, b1_blk, w2_blk, b2_blk, feat_p)

    out2d = out_p.reshape(m_pad, d_out)
    if m_pad != M:
        out2d = out2d[:M]
    return out2d.reshape(B, N, d_out)


def make_params(d_input, d_output, key):
    """Deterministic parameter init matching the PyTorch module's shapes."""
    d_hidden = d_output // 2
    k1, k2, k3, k4 = jax.random.split(key, 4)

    # Conv1d(d_input, d_hidden, 1): weight (d_hidden, d_input, 1) -> stored (d_in, d_hid)
    w1 = jax.random.normal(k1, (d_input, d_hidden), jnp.float32) * 0.1
    b1 = jax.random.normal(k2, (1, d_hidden), jnp.float32) * 0.1

    # BatchNorm1d(d_hidden), eval mode, deterministic stats -> fold into scale/shift.
    eps = 1e-5
    gamma = 1.0 + 0.01 * jnp.arange(d_hidden, dtype=jnp.float32)
    beta = 0.02 * jnp.arange(d_hidden, dtype=jnp.float32)
    running_mean = 0.05 * jnp.arange(d_hidden, dtype=jnp.float32)
    running_var = 1.0 + 0.03 * jnp.arange(d_hidden, dtype=jnp.float32)
    bn_scale = gamma / jnp.sqrt(running_var + eps)
    bn_shift = beta - running_mean * bn_scale

    # Conv1d(d_hidden, d_output, 1): stored as (d_hid, d_out)
    w2 = jax.random.normal(k3, (d_hidden, d_output), jnp.float32) * 0.1
    b2 = jax.random.normal(k4, (1, d_output), jnp.float32) * 0.1

    return {
        "w1": w1, "b1": b1,
        "bn_scale": bn_scale.reshape(1, d_hidden),
        "bn_shift": bn_shift.reshape(1, d_hidden),
        "w2": w2, "b2": b2,
    }


def _reference(point_features, positional_input, p):
    """Plain-JAX reference (un-folded BN, eval mode) for sanity checking."""
    x = positional_input.astype(jnp.float32)
    h = jnp.einsum("bnd,dh->bnh", x, p["w1"]) + p["b1"][0]
    h = h * p["bn_scale"][0] + p["bn_shift"][0]
    h = jnp.maximum(h, 0.0)
    pe = jnp.einsum("bnh,ho->bno", h, p["w2"]) + p["b2"][0]
    return point_features.astype(jnp.float32) + pe


if __name__ == "__main__":
    B, N = 2, 16
    d_input, d_output = 3, 32   # positional_input carries 3-D local point locations

    key = jax.random.PRNGKey(0)
    kf, kp, kw = jax.random.split(key, 3)

    point_features = jax.random.normal(kf, (B, N, d_output), jnp.float32)
    positional_input = jax.random.normal(kp, (B, N, d_input), jnp.float32)
    params = make_params(d_input, d_output, kw)

    ffn = jax.jit(feed_forward_positional_encoding, static_argnames=("tile_points",))

    # 1) Basic correctness (single full-extent block).
    out = jax.block_until_ready(ffn(point_features, positional_input, params))
    ref = _reference(point_features, positional_input, params)
    assert out.shape == (B, N, d_output)
    assert jnp.allclose(out, ref, atol=1e-4, rtol=1e-4), "mismatch vs reference"

    # 2) Ragged point count (M not a multiple of P) exercises the small-pad path.
    N2 = 13
    pf2 = jax.random.normal(kf, (B, N2, d_output), jnp.float32)
    pi2 = jax.random.normal(kp, (B, N2, d_input), jnp.float32)
    out2 = jax.block_until_ready(ffn(pf2, pi2, params))
    ref2 = _reference(pf2, pi2, params)
    assert out2.shape == (B, N2, d_output)
    assert jnp.allclose(out2, ref2, atol=1e-4, rtol=1e-4), "mismatch vs reference (ragged)"

    # 3) Multi-step grid (small tile_points forces 4 pipelined grid steps).
    N3 = 512
    pf3 = jax.random.normal(kf, (B, N3, d_output), jnp.float32)
    pi3 = jax.random.normal(kp, (B, N3, d_input), jnp.float32)
    out3 = jax.block_until_ready(ffn(pf3, pi3, params, tile_points=256))
    ref3 = _reference(pf3, pi3, params)
    assert out3.shape == (B, N3, d_output)
    assert jnp.allclose(out3, ref3, atol=5e-4, rtol=5e-4), "mismatch vs reference (tiled)"

    # 4) bf16 feat/pos streams (halves the dominant HBM traffic); compute stays f32.
    pf_bf = point_features.astype(jnp.bfloat16)
    pi_bf = positional_input.astype(jnp.bfloat16)
    out_bf = jax.block_until_ready(ffn(pf_bf, pi_bf, params))
    ref_bf = _reference(pf_bf.astype(jnp.float32), pi_bf.astype(jnp.float32), params)
    assert out_bf.dtype == jnp.bfloat16
    assert jnp.allclose(out_bf.astype(jnp.float32), ref_bf, atol=8e-2, rtol=5e-2), \
        "mismatch vs reference (bf16)"

    print("KERNEL_OK")
</pallas_src>

<mosaic_0001>
module attributes {stable_mosaic.version = 11 : i64} {
  func.func @_ffn_pe_kernel(%arg0: i32, %arg1: memref<4x24xf32, #tpu.memory_space<vmem>>, %arg2: memref<24x128xf32, #tpu.memory_space<vmem>>, %arg3: memref<1x128xf32, #tpu.memory_space<vmem>>, %arg4: memref<128x256xf32, #tpu.memory_space<vmem>>, %arg5: memref<1x256xf32, #tpu.memory_space<vmem>>, %arg6: memref<4x256xf32, #tpu.memory_space<vmem>>, %arg7: memref<4x256xf32, #tpu.memory_space<vmem>>) attributes {dimension_semantics = [#tpu.dimension_semantics<parallel>], iteration_bounds = array<i64: 1>, scalar_prefetch = 0 : i64, scratch_operands = 0 : i64, tpu.core_type = #tpu.core_type<tc>, window_params = [{transform_indices = @transform_0, window_bounds = array<i64: 4, 24>}, {pipeline_mode = #tpu.pipeline_mode<synchronous>, transform_indices = @transform_1, window_bounds = array<i64: 24, 128>}, {pipeline_mode = #tpu.pipeline_mode<synchronous>, transform_indices = @transform_2, window_bounds = array<i64: 1, 128>}, {pipeline_mode = #tpu.pipeline_mode<synchronous>, transform_indices = @transform_3, window_bounds = array<i64: 128, 256>}, {pipeline_mode = #tpu.pipeline_mode<synchronous>, transform_indices = @transform_4, window_bounds = array<i64: 1, 256>}, {transform_indices = @transform_5, window_bounds = array<i64: 4, 256>}, {transform_indices = @transform_6, window_bounds = array<i64: 4, 256>}]} {
    %c0 = arith.constant 0 : index
    %c0_0 = arith.constant 0 : index
    %0 = vector.load %arg1[%c0, %c0_0] : memref<4x24xf32, #tpu.memory_space<vmem>>, vector<4x24xf32>
    %c0_1 = arith.constant 0 : index
    %c0_2 = arith.constant 0 : index
    %1 = vector.load %arg2[%c0_1, %c0_2] : memref<24x128xf32, #tpu.memory_space<vmem>>, vector<24x128xf32>
    %cst = arith.constant dense<0.000000e+00> : vector<4x128xf32>
    %2 = tpu.matmul %0, %1, %cst {dimension_numbers = #tpu.dot_dimension_numbers<[1], [0], [0], [1], [0, 0, 1, 1], [], []>} : vector<4x24xf32>, vector<24x128xf32>, vector<4x128xf32> -> vector<4x128xf32>
    %c0_3 = arith.constant 0 : index
    %c0_4 = arith.constant 0 : index
    %3 = vector.load %arg3[%c0_3, %c0_4] : memref<1x128xf32, #tpu.memory_space<vmem>>, vector<1x128xf32>
    %4 = vector.broadcast %3 : vector<1x128xf32> to vector<4x128xf32>
    %5 = arith.addf %2, %4 : vector<4x128xf32>
    %cst_5 = arith.constant 0.000000e+00 : f32
    %6 = vector.broadcast %cst_5 : f32 to vector<4x128xf32>
    %7 = arith.maximumf %5, %6 : vector<4x128xf32>
    %c0_6 = arith.constant 0 : index
    %c0_7 = arith.constant 0 : index
    %8 = vector.load %arg4[%c0_6, %c0_7] : memref<128x256xf32, #tpu.memory_space<vmem>>, vector<128x256xf32>
    %cst_8 = arith.constant dense<0.000000e+00> : vector<4x256xf32>
    %9 = tpu.matmul %7, %8, %cst_8 {dimension_numbers = #tpu.dot_dimension_numbers<[1], [0], [0], [1], [0, 0, 1, 1], [], []>} : vector<4x128xf32>, vector<128x256xf32>, vector<4x256xf32> -> vector<4x256xf32>
    %c0_9 = arith.constant 0 : index
    %c0_10 = arith.constant 0 : index
    %10 = vector.load %arg5[%c0_9, %c0_10] : memref<1x256xf32, #tpu.memory_space<vmem>>, vector<1x256xf32>
    %11 = vector.broadcast %10 : vector<1x256xf32> to vector<4x256xf32>
    %12 = arith.addf %9, %11 : vector<4x256xf32>
    %c0_11 = arith.constant 0 : index
    %c0_12 = arith.constant 0 : index
    %13 = vector.load %arg6[%c0_11, %c0_12] : memref<4x256xf32, #tpu.memory_space<vmem>>, vector<4x256xf32>
    %14 = arith.addf %13, %12 : vector<4x256xf32>
    %c0_13 = arith.constant 0 : index
    %c0_14 = arith.constant 0 : index
    %15 = vector.load %arg7[%c0_13, %c0_14] : memref<4x256xf32, #tpu.memory_space<vmem>>, vector<4x256xf32>
    tpu.vector_store %arg7[%c0_13, %c0_14], %14 {strides = array<i32>} : memref<4x256xf32, #tpu.memory_space<vmem>>, vector<4x256xf32>,
    return
  }
  func.func @transform_0(%arg0: i32) -> (i32, i32) {
    %c0_i32 = arith.constant 0 : i32
    %c0_i32_0 = arith.constant 0 : i32
    return %arg0, %c0_i32 : i32, i32
  }
  func.func @transform_1(%arg0: i32) -> (i32, i32) {
    %c0_i32 = arith.constant 0 : i32
    %c0_i32_0 = arith.constant 0 : i32
    %c0_i32_1 = arith.constant 0 : i32
    return %c0_i32, %c0_i32_0 : i32, i32
  }
  func.func @transform_2(%arg0: i32) -> (i32, i32) {
    %c0_i32 = arith.constant 0 : i32
    %c0_i32_0 = arith.constant 0 : i32
    %c0_i32_1 = arith.constant 0 : i32
    return %c0_i32, %c0_i32_0 : i32, i32
  }
  func.func @transform_3(%arg0: i32) -> (i32, i32) {
    %c0_i32 = arith.constant 0 : i32
    %c0_i32_0 = arith.constant 0 : i32
    %c0_i32_1 = arith.constant 0 : i32
    return %c0_i32, %c0_i32_0 : i32, i32
  }
  func.func @transform_4(%arg0: i32) -> (i32, i32) {
    %c0_i32 = arith.constant 0 : i32
    %c0_i32_0 = arith.constant 0 : i32
    %c0_i32_1 = arith.constant 0 : i32
    return %c0_i32, %c0_i32_0 : i32, i32
  }
  func.func @transform_5(%arg0: i32) -> (i32, i32) {
    %c0_i32 = arith.constant 0 : i32
    %c0_i32_0 = arith.constant 0 : i32
    return %arg0, %c0_i32 : i32, i32
  }
  func.func @transform_6(%arg0: i32) -> (i32, i32) {
    %c0_i32 = arith.constant 0 : i32
    %c0_i32_0 = arith.constant 0 : i32
    return %arg0, %c0_i32 : i32, i32
  }
}

</mosaic_0001>

<bundles_post_ra>
// kernel: feed_forward_positional_encoding.1
= control target key start
LH: loop header
LB: loop body
LE: loop exit
PB: predicated region body
PF: predicated region fallthrough
CT: control target
= control target key end

     0   :  { %v288_v0 = vmov 0.0|0.0   ;;  %vm289_vm0 = vmmov 0   ;;  %v290_v3 = vmov 0.0   ;;  %vm34_vm1 = vcmask 195584   ;;  %s446_s1 = inlined_call_operand.vmem [shape: f32[24,128], index: 1, kind: input, shape index: {}]   ;;  %s447_s3 = inlined_call_operand.vmem [shape: f32[128,256], index: 3, kind: input, shape index: {}]   ;;  %s448_s0 = inlined_call_operand.vmem [shape: f32[4,24], index: 0, kind: input, shape index: {}]   ;;  %s449_s2 = inlined_call_operand.vmem [shape: f32[1,128], index: 2, kind: input, shape index: {}]   ;;  %s450_s4 = inlined_call_operand.vmem [shape: f32[1,256], index: 4, kind: input, shape index: {}]   ;;  %s451_s5 = inlined_call_operand.vmem [shape: f32[4,256], index: 5, kind: input, shape index: {}, may-alias: {5,6}]   ;;  %s452_s6 = inlined_call_operand.vmem [shape: f32[4,256], index: 6, kind: output, shape index: {}, may-alias: {5,6}]  }
   0x1   :  { %250 = vmatprep.subr.bf16.mxu0 %v288_v0  ;;  %v24_v1 = vld [vmem:[%s446_s1] sm:$0xff]  ;;  %v25_v2 = vld [vmem:[%s446_s1 + $0x8] sm:$0xff]  ;;  %247 = vmatprep.mubr.msk.f32.mxu0 %vm289_vm0, %v290_v3  ;;  %v112_v6 = vld [vmem:[%s447_s3 + $0x18] sm:$0xff]  ;;  %v143_v60 = vlaneseq }
   0x2   :  { %v251_v4 = vpack.c.bf16 %v25_v2, %v24_v1  ;;  %v110_v5 = vld [vmem:[%s447_s3 + $0x8] sm:$0xff]  ;;  %217 = vmatprep.mubr.f32.mxu1 %v290_v3  ;;  %v109_v8 = vld [vmem:[%s447_s3] sm:$0xff]  ;;  %v111_v9 = vld [vmem:[%s447_s3 + $0x10] sm:$0xff] }
   0x3   :  { %v253_v7 = vpack.c.bf16 %v112_v6, %v110_v5  ;;  %v114_v10 = vld [vmem:[%s447_s3 + $0x28] sm:$0xff]  ;;  %v255_v11 = vpack.c.bf16 %v111_v9, %v109_v8  ;;  %v116_v12 = vld [vmem:[%s447_s3 + $0x38] sm:$0xff]  ;;  %v113_v13 = vld [vmem:[%s447_s3 + $0x20] sm:$0xff]  ;;  %v144_v61 = vshrl.u32 %v143_v60, 7 }
   0x4   :  { %252 = vmatpush3.bf16.msra.mxu0 %v251_v4  ;;  %v115_v14 = vld [vmem:[%s447_s3 + $0x30] sm:$0xff]  ;;  %v257_v16 = vpack.c.bf16 %v116_v12, %v114_v10  ;;  %v118_v17 = vld [vmem:[%s447_s3 + $0x48] sm:$0xff]  ;;  %v120_v18 = vld [vmem:[%s447_s3 + $0x58] sm:$0xff] }
   0x5   :  { %245 = vmatprep.subr.mxu0 %v290_v3  ;;  %v26_v15 = vld [vmem:[%s446_s1 + $0x10] sm:$0xff]  ;;  %254 = vmatprep.subr.bf16.mxu1 %v253_v7  ;;  %v23_v19 = vld [vmem:[%s448_s0] sm:$0xf]  ;;  %v259_v20 = vpack.c.bf16 %v115_v14, %v113_v13  ;;  %v261_v21 = vpack.c.bf16 %v120_v18, %v118_v17  ;;  %v122_v24 = vld [vmem:[%s447_s3 + $0x68] sm:$0xff]  ;;  %v145_v62 = vsub.s32 0, %v144_v61  ;;  %v149_v0 = vsub.s32 1, %v144_v61 }
   0x6   :  { %256 = vmatpush1.bf16.msra.mxu1 %v255_v11  ;;  %v117_v22 = vld [vmem:[%s447_s3 + $0x40] sm:$0xff]  ;;  %v119_v23 = vld [vmem:[%s447_s3 + $0x50] sm:$0xff]  ;;  %v124_v25 = vld [vmem:[%s447_s3 + $0x78] sm:$0xff] }
   0x7   :  { %258 = vmatprep.subr.bf16.mxu1 %v257_v16  ;;  %v263_v26 = vpack.c.bf16 %v119_v23, %v117_v22  ;;  %v265_v27 = vpack.c.bf16 %v124_v25, %v122_v24  ;;  %v121_v28 = vld [vmem:[%s447_s3 + $0x60] sm:$0xff]  ;;  %v123_v29 = vld [vmem:[%s447_s3 + $0x70] sm:$0xff]  ;;  %v126_v30 = vld [vmem:[%s447_s3 + $0x88] sm:$0xff] }
   0x8   :  { %246 = vmatpush3.msra.mxu0 %v26_v15  ;;  %v128_v31 = vld [vmem:[%s447_s3 + $0x98] sm:$0xff]  ;;  %v267_v32 = vpack.c.bf16 %v123_v29, %v121_v28  ;;  %v125_v34 = vld [vmem:[%s447_s3 + $0x80] sm:$0xff]  ;;  %v127_v35 = vld [vmem:[%s447_s3 + $0x90] sm:$0xff] }
   0x9   :  { %248 = vmatmul.mubr.msk.f32.vlgmr.msra.gmra.mrb[0].mxu0 %vm34_vm1, %v23_v19  ;;  %v269_v33 = vpack.c.bf16 %v128_v31, %v126_v30  ;;  %v130_v36 = vld [vmem:[%s447_s3 + $0xa8] sm:$0xff]  ;;  %v132_v37 = vld [vmem:[%s447_s3 + $0xb8] sm:$0xff]  ;;  %v271_v38 = vpack.c.bf16 %v127_v35, %v125_v34  ;;  %v129_v40 = vld [vmem:[%s447_s3 + $0xa0] sm:$0xff] }
   0xa   :  { %260 = vmatpush1.bf16.msra.mxu1 %v259_v20  ;;  %v273_v39 = vpack.c.bf16 %v132_v37, %v130_v36  ;;  %v131_v41 = vld [vmem:[%s447_s3 + $0xb0] sm:$0xff]  ;;  %v134_v42 = vld [vmem:[%s447_s3 + $0xc8] sm:$0xff]  ;;  %v136_v43 = vld [vmem:[%s447_s3 + $0xd8] sm:$0xff] }
   0xb   :  { %262 = vmatprep.subr.bf16.mxu1 %v261_v21  ;;  %v275_v44 = vpack.c.bf16 %v131_v41, %v129_v40  ;;  %v277_v45 = vpack.c.bf16 %v136_v43, %v134_v42  ;;  %v133_v46 = vld [vmem:[%s447_s3 + $0xc0] sm:$0xff]  ;;  %v135_v47 = vld [vmem:[%s447_s3 + $0xd0] sm:$0xff]  ;;  %v138_v49 = vld [vmem:[%s447_s3 + $0xe8] sm:$0xff] }
   0xc   :  { %v279_v48 = vpack.c.bf16 %v135_v47, %v133_v46  ;;  %v140_v50 = vld [vmem:[%s447_s3 + $0xf8] sm:$0xff]  ;;  %v137_v52 = vld [vmem:[%s447_s3 + $0xe0] sm:$0xff]  ;;  %v139_v53 = vld [vmem:[%s447_s3 + $0xf0] sm:$0xff] }
   0xd   :  { %v281_v51 = vpack.c.bf16 %v140_v50, %v138_v49  ;;  %v283_v54 = vpack.c.bf16 %v139_v53, %v137_v52  ;;  %v235_v55 = vld [vmem:[%s449_s2] ss:$0 sm:$0xff] }
   0xe   :  { %264 = vmatpush1.bf16.msra.mxu1 %v263_v26  ;;  %v141_v63 = vld [vmem:[%s450_s4] sm:$0x3] }
   0xf   :  { %266 = vmatprep.subr.bf16.mxu1 %v265_v27  ;;  %v146_v1 = vrot.slane %v141_v63, %v145_v62  ;;  %v150_v2 = vrot.slane %v141_v63, %v149_v0  ;;  %v224_v7 = vld [vmem:[%s451_s5] sm:$0xff] }
  0x12   :  { %268 = vmatpush1.bf16.msra.mxu1 %v267_v32 }
  0x13   :  { %270 = vmatprep.subr.bf16.mxu1 %v269_v33 }
  0x16   :  { %272 = vmatpush1.bf16.msra.mxu1 %v271_v38 }
  0x17   :  { %274 = vmatprep.subr.bf16.mxu1 %v273_v39 }
  0x1a   :  { %276 = vmatpush1.bf16.msra.mxu1 %v275_v44 }
  0x1b   :  { %278 = vmatprep.subr.bf16.mxu1 %v277_v45 }
  0x1e   :  { %280 = vmatpush1.bf16.msra.mxu1 %v279_v48 }
  0x1f   :  { %282 = vmatprep.subr.bf16.mxu1 %v281_v51 }
  0x22   :  { %284 = vmatpush1.bf16.msra.mxu1 %v283_v54 }
  0xdc   :  { %v104_v56 = vpop.f32.mrb[0].mxu0 }
  0xdd   :  { %v105_v57 = vadd.f32 %v235_v55, %v104_v56  ;;  %v249_v58 = vpop.f32.mrb[1].mxu0 }
  0xdf   :  { %v108_v59 = vmax.f32 %v105_v57, 0.0 }
  0xe1   :  { %218 = vmatmul.mubr.f32.vlgmr.msra.gmra.mrb[0].mxu1 %v108_v59 }
 0x1b4   :  { %v219_v3 = vpop.f32.mrb[0].mxu1 }
 0x1b5   :  { %v220_v4 = vadd.f32 %v219_v3, %v146_v1  ;;  %v221_v5 = vpop.f32.mrb[1].mxu1 }
 0x1b6   :  { %v222_v6 = vadd.f32 %v221_v5, %v150_v2 }
 0x1b8   :  { %v227_v8 = vcombine.low %v220_v4, %v222_v6 }
 0x1ba   :  { %v229_v9 = vadd.f32 %v227_v8, %v224_v7 }
 0x1bc   :  { %230 = vst [vmem:[%s452_s6] sm:$0xff] %v229_v9 }

</bundles_post_ra>
